<compile_context>
chip_gen: v7x
topology: tpu7x:2x2x1
jax: 0.10.0
libtpu: 0.0.40
codegen_flags: <defaults>
</compile_context>

<pallas_src>
import functools

import jax
import jax.numpy as jnp
from jax import lax
from jax.experimental import pallas as pl
from jax.experimental.pallas import tpu as pltpu


def _round_up(x, m):
    return (x + m - 1) // m * m


def _sublane_multiple(dtype):
    # Native (sublane, lane) tile: (8,128) f32, (16,128) bf16, (32,128) int8.
    return max(8, 32 // jnp.dtype(dtype).itemsize)


def _vmem_capacity_bytes():
    try:
        return int(pltpu.get_tpu_info().vmem_capacity_bytes)
    except Exception:
        return 64 << 20  # conservative: v7x per-TensorCore VMEM


def _crossnet_kernel(x_ref, w_ref, b_ref, o_ref, *, n_cross, mm_dtype, n_split):
    # x_ref : (TB, Dp)            current batch tile (pipelined, double-buffered)
    # w_ref : (n_cross, Dp, Dp)   weights, pre-transposed to (in, out), VMEM-resident
    # b_ref : (n_cross, 1, Dp)    biases, VMEM-resident
    # o_ref : (TB, Dp)
    tb = x_ref.shape[0]
    sub = tb // n_split
    # Independent sub-chains: their per-layer matmuls / elementwise updates have
    # no cross dependence, so the LLO scheduler can overlap MXU and VPU work.
    x0s = [x_ref[j * sub:(j + 1) * sub, :].astype(jnp.float32) for j in range(n_split)]
    xis = list(x0s)
    for i in range(n_cross):  # n_cross is small -> static unroll
        w_i = w_ref[i]                         # (Dp, Dp) in (in, out) layout
        b_i = b_ref[i].astype(jnp.float32)     # (1, Dp)
        for j in range(n_split):
            # Canonical contraction: xi (TBs, Dp_in) x W (Dp_in, Dp_out) on the MXU,
            # f32 accumulation regardless of mm_dtype.
            lin = lax.dot_general(
                xis[j].astype(mm_dtype), w_i,
                dimension_numbers=(((1,), (0,)), ((), ())),
                preferred_element_type=jnp.float32,
            ) + b_i
            xis[j] = x0s[j] * lin + xis[j]
    for j in range(n_split):
        o_ref[j * sub:(j + 1) * sub, :] = xis[j].astype(o_ref.dtype)


def cross_net_matrix(x, weights, biases, *, tile_b=None, mm_dtype=None):
    """x: (B, D); weights: (n_cross, D, D) in PyTorch (out, in) layout; biases: (n_cross, D).

    mm_dtype: dtype for the MXU matmul (e.g. jnp.bfloat16 on v6e/v7x for ~4x
    matmul throughput and half the resident weight footprint). Defaults to the
    weights' dtype. Accumulation and the elementwise update are always f32.
    """
    B, D = x.shape
    n_cross, d_out, d_in = weights.shape
    assert d_out == D and d_in == D and biases.shape == (n_cross, D)

    if mm_dtype is None:
        mm_dtype = weights.dtype
    mm_dtype = jnp.dtype(mm_dtype)

    sub_m = _sublane_multiple(x.dtype)
    # Lane-align features to 128 (dense MXU lanes, unmasked output stores).
    Dp = _round_up(max(D, 128), 128)
    vmem_cap = int(_vmem_capacity_bytes() * 0.75)

    x_item = jnp.dtype(x.dtype).itemsize
    w_item = mm_dtype.itemsize
    w_bytes = n_cross * Dp * Dp * w_item + n_cross * Dp * 4  # resident weights + biases

    def _need(tb):
        act = 2 * 2 * tb * Dp * x_item   # double-buffered in + out tiles
        tmp = 4 * tb * Dp * 4            # x0, xi, lin (+slack) in f32
        return int(1.25 * (w_bytes + act + tmp)) + (4 << 20)

    if tile_b is None:
        if D < 128:
            # Small-D regime (e.g. the demo): the padded problem is per-step
            # overhead bound -> run the whole batch as a single grid step.
            tile_b = _round_up(B, sub_m)
        else:
            tile_b = min(512, _round_up(B, sub_m))
    tile_b = _round_up(tile_b, sub_m)
    # Shrink the batch tile if it would not fit the per-core VMEM budget.
    while tile_b > sub_m and _need(tile_b) > vmem_cap:
        tile_b = _round_up(max(tile_b // 2, sub_m), sub_m)
    assert tile_b % sub_m == 0

    Bp = _round_up(B, tile_b)

    # Pre-transpose ONCE to (n_cross, D_in, D_out); folded into the same copy
    # as the padding, amortized over all batch tiles.
    wp = jnp.swapaxes(weights, 1, 2).astype(mm_dtype)
    xp, bp = x, biases
    if Dp != D:
        xp = jnp.pad(xp, ((0, 0), (0, Dp - D)))
        wp = jnp.pad(wp, ((0, 0), (0, Dp - D), (0, Dp - D)))
        bp = jnp.pad(bp, ((0, 0), (0, Dp - D)))
    if Bp != B:
        xp = jnp.pad(xp, ((0, Bp - B), (0, 0)))
    bp = bp.reshape(n_cross, 1, Dp)  # reshape only (no HBM transpose copy)

    # Split each tile into two independent sub-chains when it is big enough to
    # keep both the MXU and the VPU busy.
    n_split = 2 if (tile_b >= 256 and tile_b % (2 * sub_m) == 0) else 1

    grid = (Bp // tile_b,)
    vmem_limit = min(max(_need(tile_b), 32 << 20), vmem_cap)

    flops = n_cross * (2 * Bp * Dp * Dp + 3 * Bp * Dp)
    bytes_accessed = 2 * Bp * Dp * x_item + w_bytes

    kernel = functools.partial(_crossnet_kernel, n_cross=n_cross,
                               mm_dtype=mm_dtype, n_split=n_split)

    out = pl.pallas_call(
        kernel,
        out_shape=jax.ShapeDtypeStruct((Bp, Dp), x.dtype),
        grid_spec=pltpu.PrefetchScalarGridSpec(
            num_scalar_prefetch=0,
            grid=grid,
            in_specs=[
                pl.BlockSpec((tile_b, Dp), lambda i: (i, 0)),
                # Grid-invariant parameters: whole arrays, resident in VMEM once
                # (no per-step DMA, no double-buffered weight copy).
                pl.BlockSpec(memory_space=pltpu.MemorySpace.VMEM),
                pl.BlockSpec(memory_space=pltpu.MemorySpace.VMEM),
            ],
            out_specs=pl.BlockSpec((tile_b, Dp), lambda i: (i, 0)),
        ),
        compiler_params=pltpu.CompilerParams(
            dimension_semantics=("parallel",),
            vmem_limit_bytes=vmem_limit,
        ),
        cost_estimate=pl.CostEstimate(
            flops=flops, transcendentals=0, bytes_accessed=bytes_accessed),
    )(xp, wp, bp)

    if Bp != B or Dp != D:
        out = out[:B, :D]
    return out


def cross_net_matrix_ref(x, weights, biases):
    """Pure-JAX reference matching the PyTorch forward."""
    x0 = x.astype(jnp.float32)
    xi = x0
    for i in range(weights.shape[0]):
        lin = xi @ weights[i].T.astype(jnp.float32) + biases[i].astype(jnp.float32)
        xi = x0 * lin + xi
    return xi.astype(x.dtype)


if __name__ == "__main__":
    B, D, N_CROSS = 200, 32, 2

    key = jax.random.PRNGKey(0)
    kx, kw, kb = jax.random.split(key, 3)

    x = jax.random.normal(kx, (B, D), dtype=jnp.float32)
    # Deterministic init mimicking nn.Linear's uniform(-1/sqrt(d_in), 1/sqrt(d_in)).
    bound = 1.0 / (D ** 0.5)
    weights = jax.random.uniform(kw, (N_CROSS, D, D), minval=-bound, maxval=bound,
                                 dtype=jnp.float32)
    biases = jax.random.uniform(kb, (N_CROSS, D), minval=-bound, maxval=bound,
                                dtype=jnp.float32)

    # Small-D demo regime: D=32 is lane-padded to 128 and the whole batch runs
    # as a single grid step. Keep the f32 matmul path here so the comparison
    # against the f32 reference is tight (pass mm_dtype=jnp.bfloat16 on
    # v6e/v7x production shapes for full MXU rate).
    out = cross_net_matrix(x, weights, biases)
    out = jax.block_until_ready(out)

    ref = cross_net_matrix_ref(x, weights, biases)
    assert out.shape == (B, D)
    assert jnp.allclose(out, ref, atol=1e-4, rtol=1e-4), "mismatch vs reference"

    print("KERNEL_OK")
</pallas_src>

<mosaic_0001>
module attributes {stable_mosaic.version = 11 : i64} {
  func.func @_crossnet_kernel(%arg0: i32, %arg1: memref<200x128xf32, #tpu.memory_space<vmem>>, %arg2: memref<2x128x128xf32, #tpu.memory_space<vmem>>, %arg3: memref<2x1x128xf32, #tpu.memory_space<vmem>>, %arg4: memref<200x128xf32, #tpu.memory_space<vmem>>) attributes {dimension_semantics = [#tpu.dimension_semantics<parallel>], iteration_bounds = array<i64: 1>, scalar_prefetch = 0 : i64, scratch_operands = 0 : i64, tpu.core_type = #tpu.core_type<tc>, window_params = [{transform_indices = @transform_0, window_bounds = array<i64: 200, 128>}, {pipeline_mode = #tpu.pipeline_mode<synchronous>, transform_indices = @transform_1, window_bounds = array<i64: 2, 128, 128>}, {pipeline_mode = #tpu.pipeline_mode<synchronous>, transform_indices = @transform_2, window_bounds = array<i64: 2, 1, 128>}, {transform_indices = @transform_3, window_bounds = array<i64: 200, 128>}]} {
    %c0 = arith.constant 0 : index
    %c0_0 = arith.constant 0 : index
    %0 = vector.load %arg1[%c0, %c0_0] : memref<200x128xf32, #tpu.memory_space<vmem>>, vector<200x128xf32>
    %c0_1 = arith.constant 0 : index
    %c0_2 = arith.constant 0 : index
    %c0_3 = arith.constant 0 : index
    %1 = vector.load %arg2[%c0_1, %c0_2, %c0_3] : memref<2x128x128xf32, #tpu.memory_space<vmem>>, vector<1x128x128xf32>
    %2 = vector.shape_cast %1 : vector<1x128x128xf32> to vector<128x128xf32>
    %c0_4 = arith.constant 0 : index
    %c0_5 = arith.constant 0 : index
    %c0_6 = arith.constant 0 : index
    %3 = vector.load %arg3[%c0_4, %c0_5, %c0_6] : memref<2x1x128xf32, #tpu.memory_space<vmem>>, vector<1x1x128xf32>
    %4 = vector.shape_cast %3 : vector<1x1x128xf32> to vector<1x128xf32>
    %cst = arith.constant dense<0.000000e+00> : vector<200x128xf32>
    %5 = tpu.matmul %0, %2, %cst {dimension_numbers = #tpu.dot_dimension_numbers<[1], [0], [0], [1], [0, 0, 1, 1], [], []>} : vector<200x128xf32>, vector<128x128xf32>, vector<200x128xf32> -> vector<200x128xf32>
    %6 = vector.broadcast %4 : vector<1x128xf32> to vector<200x128xf32>
    %7 = arith.addf %5, %6 : vector<200x128xf32>
    %8 = arith.mulf %0, %7 : vector<200x128xf32>
    %9 = arith.addf %8, %0 : vector<200x128xf32>
    %c1 = arith.constant 1 : index
    %c0_7 = arith.constant 0 : index
    %c0_8 = arith.constant 0 : index
    %10 = vector.load %arg2[%c1, %c0_7, %c0_8] : memref<2x128x128xf32, #tpu.memory_space<vmem>>, vector<1x128x128xf32>
    %11 = vector.shape_cast %10 : vector<1x128x128xf32> to vector<128x128xf32>
    %c1_9 = arith.constant 1 : index
    %c0_10 = arith.constant 0 : index
    %c0_11 = arith.constant 0 : index
    %12 = vector.load %arg3[%c1_9, %c0_10, %c0_11] : memref<2x1x128xf32, #tpu.memory_space<vmem>>, vector<1x1x128xf32>
    %13 = vector.shape_cast %12 : vector<1x1x128xf32> to vector<1x128xf32>
    %cst_12 = arith.constant dense<0.000000e+00> : vector<200x128xf32>
    %14 = tpu.matmul %9, %11, %cst_12 {dimension_numbers = #tpu.dot_dimension_numbers<[1], [0], [0], [1], [0, 0, 1, 1], [], []>} : vector<200x128xf32>, vector<128x128xf32>, vector<200x128xf32> -> vector<200x128xf32>
    %15 = vector.broadcast %13 : vector<1x128xf32> to vector<200x128xf32>
    %16 = arith.addf %14, %15 : vector<200x128xf32>
    %17 = arith.mulf %0, %16 : vector<200x128xf32>
    %18 = arith.addf %17, %9 : vector<200x128xf32>
    %c0_13 = arith.constant 0 : index
    %c0_14 = arith.constant 0 : index
    %19 = vector.load %arg4[%c0_13, %c0_14] : memref<200x128xf32, #tpu.memory_space<vmem>>, vector<200x128xf32>
    tpu.vector_store %arg4[%c0_13, %c0_14], %18 {strides = array<i32>} : memref<200x128xf32, #tpu.memory_space<vmem>>, vector<200x128xf32>,
    return
  }
  func.func @transform_0(%arg0: i32) -> (i32, i32) {
    %c0_i32 = arith.constant 0 : i32
    %c0_i32_0 = arith.constant 0 : i32
    return %arg0, %c0_i32 : i32, i32
  }
  func.func @transform_1(%arg0: i32) -> (i32, i32, i32) {
    %c0_i32 = arith.constant 0 : i32
    %c0_i32_0 = arith.constant 0 : i32
    %c0_i32_1 = arith.constant 0 : i32
    %c0_i32_2 = arith.constant 0 : i32
    return %c0_i32, %c0_i32_0, %c0_i32_1 : i32, i32, i32
  }
  func.func @transform_2(%arg0: i32) -> (i32, i32, i32) {
    %c0_i32 = arith.constant 0 : i32
    %c0_i32_0 = arith.constant 0 : i32
    %c0_i32_1 = arith.constant 0 : i32
    %c0_i32_2 = arith.constant 0 : i32
    return %c0_i32, %c0_i32_0, %c0_i32_1 : i32, i32, i32
  }
  func.func @transform_3(%arg0: i32) -> (i32, i32) {
    %c0_i32 = arith.constant 0 : i32
    %c0_i32_0 = arith.constant 0 : i32
    return %arg0, %c0_i32 : i32, i32
  }
}

</mosaic_0001>

<bundles_post_ra>
// kernel: tpu_custom_call.1
= control target key start
LH: loop header
LB: loop body
LE: loop exit
PB: predicated region body
PF: predicated region fallthrough
CT: control target
= control target key end

     0   :  { %8 = vsyncpa [#allocation3], 0  ;;  %s1565_s0 = inlined_call_operand.hbm [shape: f32[200,128], index: 0, kind: input, shape index: {}]   ;;  %s1566_s1 = inlined_call_operand.hbm [shape: f32[2,128,128], index: 1, kind: input, shape index: {}]   ;;  %s1567_s2 = inlined_call_operand.vmem [shape: f32[2,1,128], index: 2, kind: input, shape index: {}]   ;;  %s1568_s3 = inlined_call_operand.hbm [shape: f32[200,128], index: 3, kind: output, shape index: {}]  }
   0x1   :  { %9 = vsyncpa [#allocation6], 0 }
   0x2   :  { %10 = vsyncpa [#allocation4], 0  ;;  %s1066_s12 = smov [#allocation2]   ;;  %s994_s16 = scalar_lea.hbm %s1565_s0, 3200 }
   0x3   :  { %s16_s13 = sshll.u32 %s1066_s12, 4  ;;  %p995_p0 = scmp.ne.s32.totalorder %s1565_s0, %s994_s16  ;;  %s17_s13 = int_to_ptr.vmem [resolvable:$true] %s16_s13 }
   0x4   :  { %p998_p1 = scmp.lt.u32.totalorder %s994_s16, %s1565_s0 }
   0x6   :  { %p1000_p2 = pnand %p998_p1, %p995_p0 }
   0x8   :  { %1003 = shalt.err (!%p1000_p2)
}
   0x9   :  { %s1004_s21 = scalar_lea.vmem %s17_s13, 3200  ;;  %p1009_p4 = scmp.lt.s32.totalorder %s17_s13, %s17_s13 }
   0xa   :  { %p1005_p3 = scmp.ne.s32.totalorder %s17_s13, %s1004_s21  ;;  %p1010_p5 = scmp.lt.s32.totalorder %s1004_s21, %s1004_s21 }
   0xc   :  { %p1011_p6 = por %p1010_p5, %p1009_p4 }
   0xe   :  { %p1012_p7 = pnand %p1011_p6, %p1005_p3 }
  0x10   :  { %1015 = shalt.err (!%p1012_p7)
}
  0x11   :  { %s1067_s22 = smov 128   ;;  %s1068_s23 = smov 8  }
  0x12   :  { %22 = dma.hbm_to_vmem [thread:$0]  %s1565_s0, 3200, %s17_s13, [#allocation3], %s1067_s22, %s1067_s22, %s1068_s23  }
  0x13   :  { %s1069_s26 = smov [#allocation5]   ;;  %s1016_s30 = scalar_lea.hbm %s1566_s1, 4096 }
  0x14   :  { %s28_s27 = sshll.u32 %s1069_s26, 4  ;;  %p1017_p8 = scmp.ne.s32.totalorder %s1566_s1, %s1016_s30  ;;  %s29_s27 = int_to_ptr.vmem [resolvable:$true] %s28_s27 }
  0x15   :  { %p1020_p9 = scmp.lt.u32.totalorder %s1016_s30, %s1566_s1 }
  0x17   :  { %p1022_p10 = pnand %p1020_p9, %p1017_p8 }
  0x19   :  { %1025 = shalt.err (!%p1022_p10)
}
  0x1a   :  { %s1026_s8 = scalar_lea.vmem %s29_s27, 4096  ;;  %p1031_p12 = scmp.lt.s32.totalorder %s29_s27, %s29_s27 }
  0x1b   :  { %p1027_p11 = scmp.ne.s32.totalorder %s29_s27, %s1026_s8  ;;  %p1032_p13 = scmp.lt.s32.totalorder %s1026_s8, %s1026_s8 }
  0x1d   :  { %p1033_p0 = por %p1032_p13, %p1031_p12 }
  0x1f   :  { %p1034_p1 = pnand %p1033_p0, %p1027_p11 }
  0x21   :  { %1037 = shalt.err (!%p1034_p1)
}
  0x22   :  { %34 = dma.hbm_to_vmem [thread:$0]  %s1566_s1, 4096, %s29_s27, [#allocation6], %s1067_s22, %s1067_s22, %s1068_s23  }
  0x23   :  { %1060 = dma.done.wait [#allocation3], 3200  }
  0x24   :  { %1061 = vsyncadd [#allocation3], 4294964096 }
  0x25   :  { %1062 = dma.done.wait [#allocation6], 4096  }
  0x26   :  { %1063 = vsyncadd [#allocation6], 4294963200  ;;  %v1070_v0 = vmov 0.0|0.0   ;;  %vm1071_vm0 = vmmov 0   ;;  %v1072_v1 = vmov 0.0   ;;  %v68_v2 = vld [vmem:[#allocation5] sm:$0xff] }
  0x27   :  { %938 = vmatprep.subr.bf16.mxu0 %v1070_v0  ;;  %756 = vmatprep.mubr.msk.f32.mxu0 %vm1071_vm0, %v1072_v1  ;;  %v69_v3 = vld [vmem:[#allocation5 + $0x8] sm:$0xff]  ;;  %v70_v4 = vld [vmem:[#allocation5 + $0x10] sm:$0xff]  ;;  %v71_v6 = vld [vmem:[#allocation5 + $0x18] sm:$0xff] }
  0x28   :  { %962 = vmatprep.subr.bf16.mxu1 %v1070_v0  ;;  %863 = vmatprep.mubr.msk.f32.mxu1 %vm1071_vm0, %v1072_v1  ;;  %v939_v5 = vpack.c.bf16 %v69_v3, %v68_v2  ;;  %v942_v7 = vpack.c.bf16 %v71_v6, %v70_v4  ;;  %v72_v8 = vld [vmem:[#allocation5 + $0x20] sm:$0xff]  ;;  %v73_v9 = vld [vmem:[#allocation5 + $0x28] sm:$0xff]  ;;  %v74_v11 = vld [vmem:[#allocation5 + $0x30] sm:$0xff] }
  0x29   :  { %v945_v10 = vpack.c.bf16 %v73_v9, %v72_v8  ;;  %v75_v12 = vld [vmem:[#allocation5 + $0x38] sm:$0xff]  ;;  %v76_v14 = vld [vmem:[#allocation5 + $0x40] sm:$0xff]  ;;  %v77_v15 = vld [vmem:[#allocation5 + $0x48] sm:$0xff] }
  0x2a   :  { %940 = vmatpush3.bf16.msra.mxu0 %v939_v5  ;;  %v948_v13 = vpack.c.bf16 %v75_v12, %v74_v11  ;;  %v332_v16 = vld [vmem:[#allocation5 + $0x80] sm:$0xff]  ;;  %v333_v17 = vld [vmem:[#allocation5 + $0x88] sm:$0xff]  ;;  %v334_v18 = vld [vmem:[#allocation5 + $0x90] sm:$0xff]  ;;  %v951_v20 = vpack.c.bf16 %v77_v15, %v76_v14 }
  0x2b   :  { %941 = vmatprep.subr.bf16.mxu0 %v1070_v0  ;;  %v335_v19 = vld [vmem:[#allocation5 + $0x98] sm:$0xff]  ;;  %v963_v21 = vpack.c.bf16 %v333_v17, %v332_v16  ;;  %v78_v22 = vld [vmem:[#allocation5 + $0x50] sm:$0xff]  ;;  %v336_v25 = vld [vmem:[#allocation5 + $0xa0] sm:$0xff] }
  0x2c   :  { %v79_v23 = vld [vmem:[#allocation5 + $0x58] sm:$0xff]  ;;  %v966_v24 = vpack.c.bf16 %v335_v19, %v334_v18  ;;  %v337_v26 = vld [vmem:[#allocation5 + $0xa8] sm:$0xff]  ;;  %v80_v28 = vld [vmem:[#allocation5 + $0x60] sm:$0xff] }
  0x2d   :  { %964 = vmatpush3.bf16.msra.mxu1 %v963_v21  ;;  %v954_v27 = vpack.c.bf16 %v79_v23, %v78_v22  ;;  %v81_v29 = vld [vmem:[#allocation5 + $0x68] sm:$0xff]  ;;  %v969_v30 = vpack.c.bf16 %v337_v26, %v336_v25  ;;  %v338_v31 = vld [vmem:[#allocation5 + $0xb0] sm:$0xff]  ;;  %v339_v32 = vld [vmem:[#allocation5 + $0xb8] sm:$0xff] }
  0x2e   :  { %943 = vmatpush3.bf16.msra.mxu0 %v942_v7  ;;  %965 = vmatprep.subr.bf16.mxu1 %v1070_v0  ;;  %v957_v33 = vpack.c.bf16 %v81_v29, %v80_v28  ;;  %v82_v34 = vld [vmem:[#allocation5 + $0x70] sm:$0xff]  ;;  %v83_v35 = vld [vmem:[#allocation5 + $0x78] sm:$0xff]  ;;  %v972_v36 = vpack.c.bf16 %v339_v32, %v338_v31  ;;  %v340_v37 = vld [vmem:[#allocation5 + $0xc0] sm:$0xff] }
  0x2f   :  { %944 = vmatprep.subr.bf16.mxu0 %v1070_v0  ;;  %v341_v38 = vld [vmem:[#allocation5 + $0xc8] sm:$0xff]  ;;  %v960_v39 = vpack.c.bf16 %v83_v35, %v82_v34  ;;  %v342_v41 = vld [vmem:[#allocation5 + $0xd0] sm:$0xff]  ;;  %v343_v42 = vld [vmem:[#allocation5 + $0xd8] sm:$0xff] }
  0x30   :  { %v975_v40 = vpack.c.bf16 %v341_v38, %v340_v37  ;;  %v1141_v43 = vld [vmem:[#allocation2] sm:$0xff]  ;;  %v978_v44 = vpack.c.bf16 %v343_v42, %v342_v41  ;;  %v1147_v45 = vld [vmem:[#allocation2 + $0x8] sm:$0xff]  ;;  %v1153_v46 = vld [vmem:[#allocation2 + $0x10] sm:$0xff] }
  0x31   :  { %967 = vmatpush3.bf16.msra.mxu1 %v966_v24  ;;  %v1158_v47 = vld [vmem:[#allocation2 + $0x18] sm:$0xff]  ;;  %v1163_v48 = vld [vmem:[#allocation2 + $0x20] sm:$0xff]  ;;  %v1168_v49 = vld [vmem:[#allocation2 + $0x28] sm:$0xff] }
  0x32   :  { %946 = vmatpush3.bf16.msra.mxu0 %v945_v10  ;;  %968 = vmatprep.subr.bf16.mxu1 %v1070_v0  ;;  %v1173_v50 = vld [vmem:[#allocation2 + $0x30] sm:$0xff]  ;;  %v1178_v51 = vld [vmem:[#allocation2 + $0x38] sm:$0xff]  ;;  %v1183_v52 = vld [vmem:[#allocation2 + $0x40] sm:$0xff] }
  0x33   :  { %947 = vmatprep.subr.bf16.mxu0 %v1070_v0  ;;  %v1188_v53 = vld [vmem:[#allocation2 + $0x48] sm:$0xff]  ;;  %v1193_v54 = vld [vmem:[#allocation2 + $0x50] sm:$0xff]  ;;  %v1198_v55 = vld [vmem:[#allocation2 + $0x58] sm:$0xff] }
  0x34   :  { %v1203_v56 = vld [vmem:[#allocation2 + $0x60] sm:$0xff]  ;;  %v1208_v57 = vld [vmem:[#allocation2 + $0x68] sm:$0xff]  ;;  %v1213_v58 = vld [vmem:[#allocation2 + $0x70] sm:$0xff] }
  0x35   :  { %970 = vmatpush3.bf16.msra.mxu1 %v969_v30  ;;  %v1218_v59 = vld [vmem:[#allocation2 + $0x78] sm:$0xff]  ;;  %v1223_v60 = vld [vmem:[#allocation2 + $0x80] sm:$0xff]  ;;  %v1228_v61 = vld [vmem:[#allocation2 + $0x88] sm:$0xff] }
  0x36   :  { %949 = vmatpush3.bf16.msra.mxu0 %v948_v13  ;;  %971 = vmatprep.subr.bf16.mxu1 %v1070_v0  ;;  %v1233_v62 = vld [vmem:[#allocation2 + $0x90] sm:$0xff]  ;;  %v1238_v63 = vld [vmem:[#allocation2 + $0x98] sm:$0xff]  ;;  %v1243_v2 = vld [vmem:[#allocation2 + $0xa0] sm:$0xff] }
  0x37   :  { %950 = vmatprep.subr.bf16.mxu0 %v1070_v0  ;;  %v344_v3 = vld [vmem:[#allocation5 + $0xe0] sm:$0xff]  ;;  %v345_v4 = vld [vmem:[#allocation5 + $0xe8] sm:$0xff]  ;;  %v346_v7 = vld [vmem:[#allocation5 + $0xf0] sm:$0xff] }
  0x38   :  { %v1248_v5 = vld [vmem:[#allocation2 + $0xa8] sm:$0xff]  ;;  %v981_v6 = vpack.c.bf16 %v345_v4, %v344_v3  ;;  %v347_v8 = vld [vmem:[#allocation5 + $0xf8] sm:$0xff]  ;;  %v1254_v9 = vld [vmem:[#allocation2 + $0xb0] sm:$0xff] }
  0x39   :  { %973 = vmatpush3.bf16.msra.mxu1 %v972_v36  ;;  %v984_v10 = vpack.c.bf16 %v347_v8, %v346_v7  ;;  %v1259_v11 = vld [vmem:[#allocation2 + $0xb8] sm:$0xff]  ;;  %v1270_v12 = vld [vmem:[%s1567_s2] ss:$0 sm:$0xff] }
  0x3a   :  { %952 = vmatpush3.bf16.msra.mxu0 %v951_v20  ;;  %974 = vmatprep.subr.bf16.mxu1 %v1070_v0 }
  0x3b   :  { %953 = vmatprep.subr.bf16.mxu0 %v1070_v0 }
  0x3d   :  { %976 = vmatpush3.bf16.msra.mxu1 %v975_v40 }
  0x3e   :  { %955 = vmatpush3.bf16.msra.mxu0 %v954_v27  ;;  %977 = vmatprep.subr.bf16.mxu1 %v1070_v0 }
  0x3f   :  { %956 = vmatprep.subr.bf16.mxu0 %v1070_v0 }
  0x41   :  { %979 = vmatpush3.bf16.msra.mxu1 %v978_v44 }
  0x42   :  { %958 = vmatpush3.bf16.msra.mxu0 %v957_v33  ;;  %980 = vmatprep.subr.bf16.mxu1 %v1070_v0 }
  0x43   :  { %959 = vmatprep.subr.bf16.mxu0 %v1070_v0 }
  0x45   :  { %982 = vmatpush3.bf16.msra.mxu1 %v981_v6 }
  0x46   :  { %961 = vmatpush3.bf16.msra.mxu0 %v960_v39  ;;  %983 = vmatprep.subr.bf16.mxu1 %v1070_v0  ;;  %v1264_v0 = vld [vmem:[#allocation2 + $0xc0] sm:$0xff] }
  0x49   :  { %757 = vmatmul.mubr.f32.vlgmr.msra.gmra.mrb[0].mxu0 %v1141_v43  ;;  %985 = vmatpush3.bf16.msra.mxu1 %v984_v10 }
  0x4a   :  { %759 = vmatprep.mubr.msk.f32.mxu0 %vm1071_vm0, %v1072_v1 }
  0x4d   :  { %760 = vmatmul.mubr.f32.gmra.mrb[2].mxu0 %v1147_v45 }
  0x4e   :  { %762 = vmatprep.mubr.msk.f32.mxu0 %vm1071_vm0, %v1072_v1 }
  0x51   :  { %763 = vmatmul.mubr.f32.gmra.mrb[4].mxu0 %v1153_v46 }
  0x52   :  { %765 = vmatprep.mubr.msk.f32.mxu0 %vm1071_vm0, %v1072_v1 }
  0x55   :  { %766 = vmatmul.mubr.f32.gmra.mrb[6].mxu0 %v1158_v47 }
  0x56   :  { %768 = vmatprep.mubr.msk.f32.mxu0 %vm1071_vm0, %v1072_v1 }
  0x59   :  { %769 = vmatmul.mubr.f32.gmra.mrb[8].mxu0 %v1163_v48 }
  0x5a   :  { %771 = vmatprep.mubr.msk.f32.mxu0 %vm1071_vm0, %v1072_v1 }
  0x5d   :  { %772 = vmatmul.mubr.f32.gmra.mrb[10].mxu0 %v1168_v49 }
  0x5e   :  { %774 = vmatprep.mubr.msk.f32.mxu0 %vm1071_vm0, %v1072_v1 }
  0x61   :  { %775 = vmatmul.mubr.f32.gmra.mrb[12].mxu0 %v1173_v50 }
  0x62   :  { %777 = vmatprep.mubr.msk.f32.mxu0 %vm1071_vm0, %v1072_v1 }
  0x65   :  { %778 = vmatmul.mubr.f32.gmra.mrb[14].mxu0 %v1178_v51 }
  0x66   :  { %780 = vmatprep.mubr.msk.f32.mxu0 %vm1071_vm0, %v1072_v1 }
  0x69   :  { %781 = vmatmul.mubr.f32.gmra.mrb[16].mxu0 %v1183_v52 }
  0x6a   :  { %783 = vmatprep.mubr.msk.f32.mxu0 %vm1071_vm0, %v1072_v1 }
  0x6d   :  { %784 = vmatmul.mubr.f32.gmra.mrb[18].mxu0 %v1188_v53 }
  0x6e   :  { %786 = vmatprep.mubr.msk.f32.mxu0 %vm1071_vm0, %v1072_v1 }
  0x71   :  { %787 = vmatmul.mubr.f32.gmra.mrb[20].mxu0 %v1193_v54 }
  0x72   :  { %789 = vmatprep.mubr.msk.f32.mxu0 %vm1071_vm0, %v1072_v1 }
  0x75   :  { %790 = vmatmul.mubr.f32.gmra.mrb[22].mxu0 %v1198_v55 }
  0x76   :  { %792 = vmatprep.mubr.msk.f32.mxu0 %vm1071_vm0, %v1072_v1 }
  0x79   :  { %793 = vmatmul.mubr.f32.gmra.mrb[24].mxu0 %v1203_v56 }
  0x7a   :  { %795 = vmatprep.mubr.msk.f32.mxu0 %vm1071_vm0, %v1072_v1 }
  0x7d   :  { %796 = vmatmul.mubr.f32.gmra.mrb[26].mxu0 %v1208_v57 }
  0x7e   :  { %798 = vmatprep.mubr.msk.f32.mxu0 %vm1071_vm0, %v1072_v1 }
  0x81   :  { %799 = vmatmul.mubr.f32.gmra.mrb[28].mxu0 %v1213_v58 }
  0x82   :  { %801 = vmatprep.mubr.msk.f32.mxu0 %vm1071_vm0, %v1072_v1 }
  0x85   :  { %802 = vmatmul.mubr.f32.gmra.mrb[30].mxu0 %v1218_v59 }
  0x86   :  { %804 = vmatprep.mubr.msk.f32.mxu0 %vm1071_vm0, %v1072_v1 }
  0x89   :  { %805 = vmatmul.mubr.f32.gmra.mrb[32].mxu0 %v1223_v60 }
  0x8a   :  { %807 = vmatprep.mubr.msk.f32.mxu0 %vm1071_vm0, %v1072_v1 }
  0x8d   :  { %808 = vmatmul.mubr.f32.gmra.mrb[34].mxu0 %v1228_v61 }
  0x8e   :  { %810 = vmatprep.mubr.msk.f32.mxu0 %vm1071_vm0, %v1072_v1 }
  0x91   :  { %811 = vmatmul.mubr.f32.gmra.mrb[36].mxu0 %v1233_v62 }
  0x92   :  { %813 = vmatprep.mubr.msk.f32.mxu0 %vm1071_vm0, %v1072_v1 }
  0x95   :  { %814 = vmatmul.mubr.f32.gmra.mrb[38].mxu0 %v1238_v63 }
  0x96   :  { %816 = vmatprep.mubr.msk.f32.mxu0 %vm1071_vm0, %v1072_v1 }
  0x99   :  { %817 = vmatmul.mubr.f32.gmra.mrb[40].mxu0 %v1243_v2 }
  0x9a   :  { %819 = vmatprep.mubr.msk.f32.mxu0 %vm1071_vm0, %v1072_v1 }
  0x9d   :  { %820 = vmatmul.mubr.f32.gmra.mrb[42].mxu0 %v1248_v5 }
  0x9e   :  { %822 = vmatprep.mubr.msk.f32.mxu0 %vm1071_vm0, %v1072_v1 }
  0xa1   :  { %823 = vmatmul.mubr.f32.gmra.mrb[44].mxu0 %v1254_v9 }
  0xa2   :  { %825 = vmatprep.mubr.msk.f32.mxu0 %vm1071_vm0, %v1072_v1 }
  0xa5   :  { %826 = vmatmul.mubr.f32.gmra.mrb[46].mxu0 %v1259_v11 }
  0xa6   :  { %828 = vmatprep.mubr.msk.f32.mxu0 %vm1071_vm0, %v1072_v1 }
  0xa9   :  { %829 = vmatmul.mubr.f32.gmra.mrb[48].mxu0 %v1264_v0 }
 0x11c   :  { %v157_v13 = vpop.f32.mrb[0].mxu0 }
 0x11d   :  { %v158_v14 = vadd.f32 %v1270_v12, %v157_v13  ;;  %v758_v15 = vpop.f32.mrb[1].mxu0 }
 0x11f   :  { %v281_v16 = vmul.f32 %v158_v14, %v1141_v43 }
 0x120   :  { %v162_v17 = vpop.f32.mrb[2].mxu0 }
 0x121   :  { %v163_v18 = vadd.f32 %v1270_v12, %v162_v17  ;;  %v761_v19 = vpop.f32.mrb[3].mxu0  ;;  %v1276_v20 = vadd.f32 %v281_v16, %v1141_v43 }
 0x123   :  { %v282_v21 = vmul.f32 %v163_v18, %v1147_v45  ;;  %864 = vmatmul.mubr.f32.vlgmr.msra.gmra.mrb[0].mxu1 %v1276_v20 }
 0x124   :  { %v167_v22 = vpop.f32.mrb[4].mxu0  ;;  %866 = vmatprep.mubr.msk.f32.mxu1 %vm1071_vm0, %v1072_v1 }
 0x125   :  { %v168_v23 = vadd.f32 %v1270_v12, %v167_v22  ;;  %v764_v24 = vpop.f32.mrb[5].mxu0  ;;  %v1284_v25 = vadd.f32 %v282_v21, %v1147_v45 }
 0x127   :  { %v283_v26 = vmul.f32 %v168_v23, %v1153_v46  ;;  %867 = vmatmul.mubr.f32.gmra.mrb[2].mxu1 %v1284_v25 }
 0x128   :  { %v172_v27 = vpop.f32.mrb[6].mxu0  ;;  %869 = vmatprep.mubr.msk.f32.mxu1 %vm1071_vm0, %v1072_v1 }
 0x129   :  { %v173_v28 = vadd.f32 %v1270_v12, %v172_v27  ;;  %v767_v29 = vpop.f32.mrb[7].mxu0  ;;  %v1292_v30 = vadd.f32 %v283_v26, %v1153_v46 }
 0x12b   :  { %v284_v31 = vmul.f32 %v173_v28, %v1158_v47  ;;  %870 = vmatmul.mubr.f32.gmra.mrb[4].mxu1 %v1292_v30 }
 0x12c   :  { %v177_v32 = vpop.f32.mrb[8].mxu0  ;;  %872 = vmatprep.mubr.msk.f32.mxu1 %vm1071_vm0, %v1072_v1 }
 0x12d   :  { %v178_v33 = vadd.f32 %v1270_v12, %v177_v32  ;;  %v770_v34 = vpop.f32.mrb[9].mxu0  ;;  %v1300_v35 = vadd.f32 %v284_v31, %v1158_v47 }
 0x12f   :  { %v285_v36 = vmul.f32 %v178_v33, %v1163_v48  ;;  %873 = vmatmul.mubr.f32.gmra.mrb[6].mxu1 %v1300_v35 }
 0x130   :  { %v182_v37 = vpop.f32.mrb[10].mxu0  ;;  %875 = vmatprep.mubr.msk.f32.mxu1 %vm1071_vm0, %v1072_v1 }
 0x131   :  { %v183_v38 = vadd.f32 %v1270_v12, %v182_v37  ;;  %v773_v39 = vpop.f32.mrb[11].mxu0  ;;  %v1308_v40 = vadd.f32 %v285_v36, %v1163_v48 }
 0x133   :  { %v286_v41 = vmul.f32 %v183_v38, %v1168_v49  ;;  %876 = vmatmul.mubr.f32.gmra.mrb[8].mxu1 %v1308_v40 }
 0x134   :  { %v187_v42 = vpop.f32.mrb[12].mxu0  ;;  %878 = vmatprep.mubr.msk.f32.mxu1 %vm1071_vm0, %v1072_v1 }
 0x135   :  { %v188_v44 = vadd.f32 %v1270_v12, %v187_v42  ;;  %v776_v3 = vpop.f32.mrb[13].mxu0  ;;  %v1316_v4 = vadd.f32 %v286_v41, %v1168_v49 }
 0x137   :  { %v287_v6 = vmul.f32 %v188_v44, %v1173_v50  ;;  %879 = vmatmul.mubr.f32.gmra.mrb[10].mxu1 %v1316_v4 }
 0x138   :  { %v192_v7 = vpop.f32.mrb[14].mxu0  ;;  %881 = vmatprep.mubr.msk.f32.mxu1 %vm1071_vm0, %v1072_v1 }
 0x139   :  { %v193_v8 = vadd.f32 %v1270_v12, %v192_v7  ;;  %v779_v10 = vpop.f32.mrb[15].mxu0  ;;  %v1324_v13 = vadd.f32 %v287_v6, %v1173_v50 }
 0x13b   :  { %v288_v14 = vmul.f32 %v193_v8, %v1178_v51  ;;  %882 = vmatmul.mubr.f32.gmra.mrb[12].mxu1 %v1324_v13 }
 0x13c   :  { %v197_v15 = vpop.f32.mrb[16].mxu0  ;;  %884 = vmatprep.mubr.msk.f32.mxu1 %vm1071_vm0, %v1072_v1 }
 0x13d   :  { %v198_v16 = vadd.f32 %v1270_v12, %v197_v15  ;;  %v782_v17 = vpop.f32.mrb[17].mxu0  ;;  %v1332_v18 = vadd.f32 %v288_v14, %v1178_v51 }
 0x13f   :  { %v289_v19 = vmul.f32 %v198_v16, %v1183_v52  ;;  %885 = vmatmul.mubr.f32.gmra.mrb[14].mxu1 %v1332_v18 }
 0x140   :  { %v202_v21 = vpop.f32.mrb[18].mxu0  ;;  %887 = vmatprep.mubr.msk.f32.mxu1 %vm1071_vm0, %v1072_v1 }
 0x141   :  { %v203_v22 = vadd.f32 %v1270_v12, %v202_v21  ;;  %v785_v23 = vpop.f32.mrb[19].mxu0  ;;  %v1340_v24 = vadd.f32 %v289_v19, %v1183_v52 }
 0x143   :  { %v290_v26 = vmul.f32 %v203_v22, %v1188_v53  ;;  %888 = vmatmul.mubr.f32.gmra.mrb[16].mxu1 %v1340_v24 }
 0x144   :  { %v207_v27 = vpop.f32.mrb[20].mxu0  ;;  %890 = vmatprep.mubr.msk.f32.mxu1 %vm1071_vm0, %v1072_v1 }
 0x145   :  { %v208_v28 = vadd.f32 %v1270_v12, %v207_v27  ;;  %v788_v29 = vpop.f32.mrb[21].mxu0  ;;  %v1348_v31 = vadd.f32 %v290_v26, %v1188_v53 }
 0x147   :  { %v291_v32 = vmul.f32 %v208_v28, %v1193_v54  ;;  %891 = vmatmul.mubr.f32.gmra.mrb[18].mxu1 %v1348_v31 }
 0x148   :  { %v212_v33 = vpop.f32.mrb[22].mxu0  ;;  %893 = vmatprep.mubr.msk.f32.mxu1 %vm1071_vm0, %v1072_v1 }
 0x149   :  { %v213_v34 = vadd.f32 %v1270_v12, %v212_v33  ;;  %v791_v36 = vpop.f32.mrb[23].mxu0  ;;  %v1356_v37 = vadd.f32 %v291_v32, %v1193_v54 }
 0x14b   :  { %v292_v38 = vmul.f32 %v213_v34, %v1198_v55  ;;  %894 = vmatmul.mubr.f32.gmra.mrb[20].mxu1 %v1356_v37 }
 0x14c   :  { %v217_v39 = vpop.f32.mrb[24].mxu0  ;;  %896 = vmatprep.mubr.msk.f32.mxu1 %vm1071_vm0, %v1072_v1 }
 0x14d   :  { %v218_v41 = vadd.f32 %v1270_v12, %v217_v39  ;;  %v794_v42 = vpop.f32.mrb[25].mxu0  ;;  %v1364_v44 = vadd.f32 %v292_v38, %v1198_v55 }
 0x14f   :  { %v293_v3 = vmul.f32 %v218_v41, %v1203_v56  ;;  %897 = vmatmul.mubr.f32.gmra.mrb[22].mxu1 %v1364_v44 }
 0x150   :  { %v222_v6 = vpop.f32.mrb[26].mxu0  ;;  %899 = vmatprep.mubr.msk.f32.mxu1 %vm1071_vm0, %v1072_v1 }
 0x151   :  { %v223_v7 = vadd.f32 %v1270_v12, %v222_v6  ;;  %v797_v8 = vpop.f32.mrb[27].mxu0  ;;  %v1372_v10 = vadd.f32 %v293_v3, %v1203_v56 }
 0x153   :  { %v294_v14 = vmul.f32 %v223_v7, %v1208_v57  ;;  %900 = vmatmul.mubr.f32.gmra.mrb[24].mxu1 %v1372_v10 }
 0x154   :  { %v227_v15 = vpop.f32.mrb[28].mxu0  ;;  %902 = vmatprep.mubr.msk.f32.mxu1 %vm1071_vm0, %v1072_v1 }
 0x155   :  { %v228_v16 = vadd.f32 %v1270_v12, %v227_v15  ;;  %v800_v17 = vpop.f32.mrb[29].mxu0  ;;  %v1380_v19 = vadd.f32 %v294_v14, %v1208_v57 }
 0x157   :  { %v295_v21 = vmul.f32 %v228_v16, %v1213_v58  ;;  %903 = vmatmul.mubr.f32.gmra.mrb[26].mxu1 %v1380_v19 }
 0x158   :  { %v232_v22 = vpop.f32.mrb[30].mxu0  ;;  %905 = vmatprep.mubr.msk.f32.mxu1 %vm1071_vm0, %v1072_v1 }
 0x159   :  { %v233_v23 = vadd.f32 %v1270_v12, %v232_v22  ;;  %v803_v26 = vpop.f32.mrb[31].mxu0  ;;  %v1388_v27 = vadd.f32 %v295_v21, %v1213_v58 }
 0x15b   :  { %v296_v28 = vmul.f32 %v233_v23, %v1218_v59  ;;  %906 = vmatmul.mubr.f32.gmra.mrb[28].mxu1 %v1388_v27 }
 0x15c   :  { %v237_v29 = vpop.f32.mrb[32].mxu0  ;;  %908 = vmatprep.mubr.msk.f32.mxu1 %vm1071_vm0, %v1072_v1 }
 0x15d   :  { %v238_v32 = vadd.f32 %v1270_v12, %v237_v29  ;;  %v806_v33 = vpop.f32.mrb[33].mxu0  ;;  %v1396_v34 = vadd.f32 %v296_v28, %v1218_v59 }
 0x15f   :  { %v297_v36 = vmul.f32 %v238_v32, %v1223_v60  ;;  %909 = vmatmul.mubr.f32.gmra.mrb[30].mxu1 %v1396_v34 }
 0x160   :  { %v242_v38 = vpop.f32.mrb[34].mxu0  ;;  %911 = vmatprep.mubr.msk.f32.mxu1 %vm1071_vm0, %v1072_v1 }
 0x161   :  { %v243_v39 = vadd.f32 %v1270_v12, %v242_v38  ;;  %v809_v41 = vpop.f32.mrb[35].mxu0  ;;  %v1404_v42 = vadd.f32 %v297_v36, %v1223_v60 }
 0x163   :  { %v298_v3 = vmul.f32 %v243_v39, %v1228_v61  ;;  %912 = vmatmul.mubr.f32.gmra.mrb[32].mxu1 %v1404_v42 }
 0x164   :  { %v247_v6 = vpop.f32.mrb[36].mxu0  ;;  %914 = vmatprep.mubr.msk.f32.mxu1 %vm1071_vm0, %v1072_v1 }
 0x165   :  { %v248_v7 = vadd.f32 %v1270_v12, %v247_v6  ;;  %v812_v8 = vpop.f32.mrb[37].mxu0  ;;  %v1412_v14 = vadd.f32 %v298_v3, %v1228_v61 }
 0x167   :  { %v299_v15 = vmul.f32 %v248_v7, %v1233_v62  ;;  %915 = vmatmul.mubr.f32.gmra.mrb[34].mxu1 %v1412_v14 }
 0x168   :  { %v252_v16 = vpop.f32.mrb[38].mxu0  ;;  %917 = vmatprep.mubr.msk.f32.mxu1 %vm1071_vm0, %v1072_v1 }
 0x169   :  { %v253_v17 = vadd.f32 %v1270_v12, %v252_v16  ;;  %v815_v21 = vpop.f32.mrb[39].mxu0  ;;  %v1420_v22 = vadd.f32 %v299_v15, %v1233_v62 }
 0x16b   :  { %v300_v23 = vmul.f32 %v253_v17, %v1238_v63  ;;  %918 = vmatmul.mubr.f32.gmra.mrb[36].mxu1 %v1420_v22 }
 0x16c   :  { %v257_v26 = vpop.f32.mrb[40].mxu0  ;;  %920 = vmatprep.mubr.msk.f32.mxu1 %vm1071_vm0, %v1072_v1 }
 0x16d   :  { %v258_v28 = vadd.f32 %v1270_v12, %v257_v26  ;;  %v818_v29 = vpop.f32.mrb[41].mxu0  ;;  %v1428_v32 = vadd.f32 %v300_v23, %v1238_v63 }
 0x16f   :  { %v301_v33 = vmul.f32 %v258_v28, %v1243_v2  ;;  %921 = vmatmul.mubr.f32.gmra.mrb[38].mxu1 %v1428_v32 }
 0x170   :  { %v262_v36 = vpop.f32.mrb[42].mxu0  ;;  %923 = vmatprep.mubr.msk.f32.mxu1 %vm1071_vm0, %v1072_v1 }
 0x171   :  { %v263_v38 = vadd.f32 %v1270_v12, %v262_v36  ;;  %v821_v39 = vpop.f32.mrb[43].mxu0  ;;  %v1436_v41 = vadd.f32 %v301_v33, %v1243_v2 }
 0x173   :  { %v302_v3 = vmul.f32 %v263_v38, %v1248_v5  ;;  %924 = vmatmul.mubr.f32.gmra.mrb[40].mxu1 %v1436_v41 }
 0x174   :  { %v267_v6 = vpop.f32.mrb[44].mxu0  ;;  %926 = vmatprep.mubr.msk.f32.mxu1 %vm1071_vm0, %v1072_v1 }
 0x175   :  { %v268_v7 = vadd.f32 %v1270_v12, %v267_v6  ;;  %v824_v8 = vpop.f32.mrb[45].mxu0  ;;  %v1444_v15 = vadd.f32 %v302_v3, %v1248_v5 }
 0x177   :  { %v303_v16 = vmul.f32 %v268_v7, %v1254_v9  ;;  %927 = vmatmul.mubr.f32.gmra.mrb[42].mxu1 %v1444_v15 }
 0x178   :  { %v272_v17 = vpop.f32.mrb[46].mxu0  ;;  %929 = vmatprep.mubr.msk.f32.mxu1 %vm1071_vm0, %v1072_v1 }
 0x179   :  { %v273_v21 = vadd.f32 %v1270_v12, %v272_v17  ;;  %v827_v23 = vpop.f32.mrb[47].mxu0  ;;  %v1452_v26 = vadd.f32 %v303_v16, %v1254_v9 }
 0x17b   :  { %v304_v28 = vmul.f32 %v273_v21, %v1259_v11  ;;  %930 = vmatmul.mubr.f32.gmra.mrb[44].mxu1 %v1452_v26 }
 0x17c   :  { %v277_v29 = vpop.f32.mrb[48].mxu0  ;;  %932 = vmatprep.mubr.msk.f32.mxu1 %vm1071_vm0, %v1072_v1 }
 0x17d   :  { %v278_v33 = vadd.f32 %v1270_v12, %v277_v29  ;;  %v830_v36 = vpop.f32.mrb[49].mxu0  ;;  %v1460_v38 = vadd.f32 %v304_v28, %v1259_v11  ;;  %v1473_v12 = vld [vmem:[%s1567_s2 + $0x1] ss:$0 sm:$0xff]  ;;  %s1073_s2 = smov [#allocation7]  }
 0x17e   :  { %s626_s13 = sshll.u32 %s1073_s2, 4  ;;  %s627_s13 = int_to_ptr.vmem [resolvable:$true] %s626_s13 }
 0x17f   :  { %v305_v39 = vmul.f32 %v278_v33, %v1264_v0  ;;  %933 = vmatmul.mubr.f32.gmra.mrb[46].mxu1 %v1460_v38  ;;  %s1038_s14 = scalar_lea.vmem %s627_s13, 3200  ;;  %p1043_p3 = scmp.lt.s32.totalorder %s627_s13, %s627_s13 }
 0x180   :  { %935 = vmatprep.mubr.msk.f32.mxu1 %vm1071_vm0, %v1072_v1  ;;  %p1039_p2 = scmp.ne.s32.totalorder %s627_s13, %s1038_s14  ;;  %p1044_p4 = scmp.lt.s32.totalorder %s1038_s14, %s1038_s14 }
 0x181   :  { %v1467_v3 = vadd.f32 %v305_v39, %v1264_v0 }
 0x182   :  { %p1045_p5 = por %p1044_p4, %p1043_p3 }
 0x183   :  { %936 = vmatmul.mubr.f32.gmra.mrb[48].mxu1 %v1467_v3 }
 0x184   :  { %p1046_p6 = pnand %p1045_p5, %p1039_p2 }
 0x1f6   :  { %v422_v6 = vpop.f32.mrb[0].mxu1 }
 0x1f7   :  { %v423_v7 = vadd.f32 %v1473_v12, %v422_v6  ;;  %v865_v8 = vpop.f32.mrb[1].mxu1 }
 0x1f9   :  { %v546_v16 = vmul.f32 %v423_v7, %v1141_v43 }
 0x1fa   :  { %v427_v17 = vpop.f32.mrb[2].mxu1 }
 0x1fb   :  { %v571_v21 = vadd.f32 %v546_v16, %v1276_v20  ;;  %v428_v1 = vadd.f32 %v1473_v12, %v427_v17  ;;  %v868_v23 = vpop.f32.mrb[3].mxu1 }
 0x1fd   :  { %596 = vst [vmem:[#allocation7] sm:$0xff] %v571_v21  ;;  %v547_v28 = vmul.f32 %v428_v1, %v1147_v45 }
 0x1fe   :  { %v432_v29 = vpop.f32.mrb[4].mxu1 }
 0x1ff   :  { %v572_v33 = vadd.f32 %v547_v28, %v1284_v25  ;;  %v433_v36 = vadd.f32 %v1473_v12, %v432_v29  ;;  %v871_v39 = vpop.f32.mrb[5].mxu1 }
 0x201   :  { %597 = vst [vmem:[#allocation7 + $0x8] sm:$0xff] %v572_v33  ;;  %v548_v6 = vmul.f32 %v433_v36, %v1153_v46 }
 0x202   :  { %v437_v8 = vpop.f32.mrb[6].mxu1 }
 0x203   :  { %v573_v43 = vadd.f32 %v548_v6, %v1292_v30  ;;  %v438_v20 = vadd.f32 %v1473_v12, %v437_v8  ;;  %v874_v7 = vpop.f32.mrb[7].mxu1 }
 0x205   :  { %598 = vst [vmem:[#allocation7 + $0x10] sm:$0xff] %v573_v43  ;;  %v549_v16 = vmul.f32 %v438_v20, %v1158_v47 }
 0x206   :  { %v442_v17 = vpop.f32.mrb[8].mxu1 }
 0x207   :  { %v574_v45 = vadd.f32 %v549_v16, %v1300_v35  ;;  %v443_v25 = vadd.f32 %v1473_v12, %v442_v17  ;;  %v877_v21 = vpop.f32.mrb[9].mxu1 }
 0x209   :  { %599 = vst [vmem:[#allocation7 + $0x18] sm:$0xff] %v574_v45  ;;  %v550_v1 = vmul.f32 %v443_v25, %v1163_v48 }
 0x20a   :  { %v447_v23 = vpop.f32.mrb[10].mxu1 }
 0x20b   :  { %v575_v46 = vadd.f32 %v550_v1, %v1308_v40  ;;  %v448_v30 = vadd.f32 %v1473_v12, %v447_v23  ;;  %v880_v28 = vpop.f32.mrb[11].mxu1 }
 0x20d   :  { %600 = vst [vmem:[#allocation7 + $0x20] sm:$0xff] %v575_v46  ;;  %v551_v29 = vmul.f32 %v448_v30, %v1168_v49 }
 0x20e   :  { %v452_v33 = vpop.f32.mrb[12].mxu1 }
 0x20f   :  { %v576_v47 = vadd.f32 %v551_v29, %v1316_v4  ;;  %v453_v35 = vadd.f32 %v1473_v12, %v452_v33  ;;  %v883_v36 = vpop.f32.mrb[13].mxu1 }
 0x211   :  { %601 = vst [vmem:[#allocation7 + $0x28] sm:$0xff] %v576_v47  ;;  %v552_v39 = vmul.f32 %v453_v35, %v1173_v50 }
 0x212   :  { %v457_v6 = vpop.f32.mrb[14].mxu1 }
 0x213   :  { %v577_v48 = vadd.f32 %v552_v39, %v1324_v13  ;;  %v458_v40 = vadd.f32 %v1473_v12, %v457_v6  ;;  %v886_v8 = vpop.f32.mrb[15].mxu1 }
 0x215   :  { %602 = vst [vmem:[#allocation7 + $0x30] sm:$0xff] %v577_v48  ;;  %v553_v43 = vmul.f32 %v458_v40, %v1178_v51 }
 0x216   :  { %v462_v20 = vpop.f32.mrb[16].mxu1 }
 0x217   :  { %v578_v49 = vadd.f32 %v553_v43, %v1332_v18  ;;  %v463_v4 = vadd.f32 %v1473_v12, %v462_v20  ;;  %v889_v7 = vpop.f32.mrb[17].mxu1 }
 0x219   :  { %603 = vst [vmem:[#allocation7 + $0x38] sm:$0xff] %v578_v49  ;;  %v554_v16 = vmul.f32 %v463_v4, %v1183_v52 }
 0x21a   :  { %v467_v17 = vpop.f32.mrb[18].mxu1 }
 0x21b   :  { %v579_v50 = vadd.f32 %v554_v16, %v1340_v24  ;;  %v468_v13 = vadd.f32 %v1473_v12, %v467_v17  ;;  %v892_v45 = vpop.f32.mrb[19].mxu1 }
 0x21d   :  { %604 = vst [vmem:[#allocation7 + $0x40] sm:$0xff] %v579_v50  ;;  %v555_v25 = vmul.f32 %v468_v13, %v1188_v53 }
 0x21e   :  { %v472_v21 = vpop.f32.mrb[20].mxu1 }
 0x21f   :  { %v580_v51 = vadd.f32 %v555_v25, %v1348_v31  ;;  %v473_v18 = vadd.f32 %v1473_v12, %v472_v21  ;;  %v895_v1 = vpop.f32.mrb[21].mxu1 }
 0x221   :  { %605 = vst [vmem:[#allocation7 + $0x48] sm:$0xff] %v580_v51  ;;  %v556_v23 = vmul.f32 %v473_v18, %v1193_v54 }
 0x222   :  { %v477_v46 = vpop.f32.mrb[22].mxu1 }
 0x223   :  { %v581_v52 = vadd.f32 %v556_v23, %v1356_v37  ;;  %v478_v24 = vadd.f32 %v1473_v12, %v477_v46  ;;  %v898_v30 = vpop.f32.mrb[23].mxu1 }
 0x225   :  { %606 = vst [vmem:[#allocation7 + $0x50] sm:$0xff] %v581_v52  ;;  %v557_v28 = vmul.f32 %v478_v24, %v1198_v55 }
 0x226   :  { %v482_v29 = vpop.f32.mrb[24].mxu1 }
 0x227   :  { %v582_v53 = vadd.f32 %v557_v28, %v1364_v44  ;;  %v483_v31 = vadd.f32 %v1473_v12, %v482_v29  ;;  %v901_v33 = vpop.f32.mrb[25].mxu1 }
 0x229   :  { %607 = vst [vmem:[#allocation7 + $0x58] sm:$0xff] %v582_v53  ;;  %v558_v47 = vmul.f32 %v483_v31, %v1203_v56 }
 0x22a   :  { %v487_v35 = vpop.f32.mrb[26].mxu1 }
 0x22b   :  { %v583_v54 = vadd.f32 %v558_v47, %v1372_v10  ;;  %v488_v37 = vadd.f32 %v1473_v12, %v487_v35  ;;  %v904_v36 = vpop.f32.mrb[27].mxu1 }
 0x22d   :  { %608 = vst [vmem:[#allocation7 + $0x60] sm:$0xff] %v583_v54  ;;  %v559_v39 = vmul.f32 %v488_v37, %v1208_v57 }
 0x22e   :  { %v492_v6 = vpop.f32.mrb[28].mxu1 }
 0x22f   :  { %v584_v55 = vadd.f32 %v559_v39, %v1380_v19  ;;  %v493_v44 = vadd.f32 %v1473_v12, %v492_v6  ;;  %v907_v48 = vpop.f32.mrb[29].mxu1 }
 0x231   :  { %609 = vst [vmem:[#allocation7 + $0x68] sm:$0xff] %v584_v55  ;;  %v560_v40 = vmul.f32 %v493_v44, %v1213_v58 }
 0x232   :  { %v497_v8 = vpop.f32.mrb[30].mxu1 }
 0x233   :  { %v585_v56 = vadd.f32 %v560_v40, %v1388_v27  ;;  %v498_v10 = vadd.f32 %v1473_v12, %v497_v8  ;;  %v910_v43 = vpop.f32.mrb[31].mxu1 }
 0x235   :  { %610 = vst [vmem:[#allocation7 + $0x70] sm:$0xff] %v585_v56  ;;  %v561_v20 = vmul.f32 %v498_v10, %v1218_v59 }
 0x236   :  { %v502_v49 = vpop.f32.mrb[32].mxu1 }
 0x237   :  { %v586_v57 = vadd.f32 %v561_v20, %v1396_v34  ;;  %v503_v19 = vadd.f32 %v1473_v12, %v502_v49  ;;  %v913_v4 = vpop.f32.mrb[33].mxu1 }
 0x239   :  { %611 = vst [vmem:[#allocation7 + $0x78] sm:$0xff] %v586_v57  ;;  %v562_v7 = vmul.f32 %v503_v19, %v1223_v60 }
 0x23a   :  { %v507_v16 = vpop.f32.mrb[34].mxu1 }
 0x23b   :  { %v587_v58 = vadd.f32 %v562_v7, %v1404_v42  ;;  %v508_v27 = vadd.f32 %v1473_v12, %v507_v16  ;;  %v916_v17 = vpop.f32.mrb[35].mxu1 }
 0x23d   :  { %612 = vst [vmem:[#allocation7 + $0x80] sm:$0xff] %v587_v58  ;;  %v563_v50 = vmul.f32 %v508_v27, %v1228_v61 }
 0x23e   :  { %v512_v13 = vpop.f32.mrb[36].mxu1 }
 0x23f   :  { %v588_v59 = vadd.f32 %v563_v50, %v1412_v14  ;;  %v513_v34 = vadd.f32 %v1473_v12, %v512_v13  ;;  %v919_v45 = vpop.f32.mrb[37].mxu1 }
 0x241   :  { %613 = vst [vmem:[#allocation7 + $0x88] sm:$0xff] %v588_v59  ;;  %v564_v25 = vmul.f32 %v513_v34, %v1233_v62 }
 0x242   :  { %v517_v21 = vpop.f32.mrb[38].mxu1 }
 0x243   :  { %v589_v60 = vadd.f32 %v564_v25, %v1420_v22  ;;  %v518_v42 = vadd.f32 %v1473_v12, %v517_v21  ;;  %v922_v51 = vpop.f32.mrb[39].mxu1 }
 0x245   :  { %614 = vst [vmem:[#allocation7 + $0x90] sm:$0xff] %v589_v60  ;;  %v565_v18 = vmul.f32 %v518_v42, %v1238_v63 }
 0x246   :  { %v522_v1 = vpop.f32.mrb[40].mxu1 }
 0x247   :  { %v590_v61 = vadd.f32 %v565_v18, %v1428_v32  ;;  %v523_v14 = vadd.f32 %v1473_v12, %v522_v1  ;;  %v925_v23 = vpop.f32.mrb[41].mxu1 }
 0x249   :  { %615 = vst [vmem:[#allocation7 + $0x98] sm:$0xff] %v590_v61  ;;  %v566_v46 = vmul.f32 %v523_v14, %v1243_v2 }
 0x24a   :  { %v527_v52 = vpop.f32.mrb[42].mxu1 }
 0x24b   :  { %v591_v62 = vadd.f32 %v566_v46, %v1436_v41  ;;  %v528_v22 = vadd.f32 %v1473_v12, %v527_v52  ;;  %v928_v24 = vpop.f32.mrb[43].mxu1 }
 0x24d   :  { %616 = vst [vmem:[#allocation7 + $0xa0] sm:$0xff] %v591_v62  ;;  %v567_v30 = vmul.f32 %v528_v22, %v1248_v5 }
 0x24e   :  { %v532_v28 = vpop.f32.mrb[44].mxu1 }
 0x24f   :  { %v592_v63 = vadd.f32 %v567_v30, %v1444_v15  ;;  %v533_v32 = vadd.f32 %v1473_v12, %v532_v28  ;;  %v931_v29 = vpop.f32.mrb[45].mxu1 }
 0x251   :  { %617 = vst [vmem:[#allocation7 + $0xa8] sm:$0xff] %v592_v63  ;;  %v568_v53 = vmul.f32 %v533_v32, %v1254_v9 }
 0x252   :  { %v537_v31 = vpop.f32.mrb[46].mxu1 }
 0x253   :  { %v593_v2 = vadd.f32 %v568_v53, %v1452_v26  ;;  %v538_v41 = vadd.f32 %v1473_v12, %v537_v31  ;;  %v934_v33 = vpop.f32.mrb[47].mxu1 }
 0x255   :  { %618 = vst [vmem:[#allocation7 + $0xb0] sm:$0xff] %v593_v2  ;;  %v569_v47 = vmul.f32 %v538_v41, %v1259_v11 }
 0x256   :  { %v542_v35 = vpop.f32.mrb[48].mxu1 }
 0x257   :  { %v594_v5 = vadd.f32 %v569_v47, %v1460_v38  ;;  %v543_v15 = vadd.f32 %v1473_v12, %v542_v35  ;;  %v937_v54 = vpop.f32.mrb[49].mxu1 }
 0x259   :  { %619 = vst [vmem:[#allocation7 + $0xb8] sm:$0xff] %v594_v5  ;;  %v570_v9 = vmul.f32 %v543_v15, %v1264_v0 }
 0x25b   :  { %v595_v37 = vadd.f32 %v570_v9, %v1467_v3 }
 0x25d   :  { %620 = vst [vmem:[#allocation7 + $0xc0] sm:$0xff] %v595_v37 }
 0x25e   :  { %1049 = shalt.err (!%p1046_p6)
}
 0x25f   :  { %s1050_s17 = scalar_lea.hbm %s1568_s3, 3200 }
 0x260   :  { %p1051_p7 = scmp.ne.s32.totalorder %s1568_s3, %s1050_s17  ;;  %p1054_p8 = scmp.lt.u32.totalorder %s1050_s17, %s1568_s3 }
 0x262   :  { %p1056_p9 = pnand %p1054_p8, %p1051_p7 }
 0x264   :  { %1059 = shalt.err (!%p1056_p9)
}
 0x265   :  { %632 = dma.vmem_to_hbm [thread:$0]  %s627_s13, 3200, %s1568_s3, [#allocation4], %s1067_s22, %s1067_s22, %s1068_s23  }
 0x266   :  { %1064 = dma.done.wait [#allocation4], 3200  }
 0x267   :  { %1065 = vsyncadd [#allocation4], 4294964096 }
 0x268   :  { %636 = vsyncpa [#allocation3], 1 }
 0x269   :  { %637 = vsyncpa [#allocation6], 1 }
 0x26a   :  { %638 = vsyncpa [#allocation4], 1 }

</bundles_post_ra>
